<compile_context>
chip_gen: v7x
topology: tpu7x:2x2x1
jax: 0.10.0
libtpu: 0.0.40
codegen_flags: <defaults>
</compile_context>

<pallas_src>
import functools
import math

import jax
import jax.numpy as jnp
from jax.experimental import pallas as pl
from jax.experimental.pallas import tpu as pltpu

# ------------------------- small demo configuration -------------------------
# (module defaults are 2560/8/10240/32/51200 -- scaled down, same structure)
VOCAB = 128
EMBED = 64
NUM_HEADS = 8
HEAD_DIM = EMBED // NUM_HEADS
FFN_HIDDEN = 128
NUM_LAYERS = 2
LN_EPS = 1e-5

# Generation-tunable tile sizes (v6e/v7x defaults; use TILE_M=128 on v5e).
TILE_M = 256
TILE_N = 512
TILE_K = 2048
WEIGHT_DTYPE = jnp.bfloat16


def _round_up(x, m):
    return ((x + m - 1) // m) * m


def _erf(x):
    # Abramowitz & Stegun 7.1.26 polynomial erf (|err| < 1.5e-7 ~ f32 eps).
    # Mosaic has no native erf lowering; matches torch's exact (erf) nn.GELU().
    a1, a2, a3, a4, a5 = 0.254829592, -0.284496736, 1.421413741, -1.453152027, 1.061405429
    p = 0.3275911
    sgn = jnp.where(x >= 0.0, 1.0, -1.0)
    ax = jnp.abs(x)
    t = 1.0 / (1.0 + p * ax)
    poly = ((((a5 * t + a4) * t + a3) * t + a2) * t + a1) * t
    return sgn * (1.0 - poly * jnp.exp(-ax * ax))


# --------------------------- fused linear kernel -----------------------------
def _fused_linear_kernel(*refs, n_k, has_ln, has_res, activation, eps):
    idx = 0
    x_ref = refs[idx]; idx += 1
    w_ref = refs[idx]; idx += 1
    b_ref = refs[idx]; idx += 1
    if has_ln:
        g_ref = refs[idx]; idx += 1
        bb_ref = refs[idx]; idx += 1
    if has_res:
        r_ref = refs[idx]; idx += 1
    o_ref = refs[idx]; idx += 1
    acc_ref = refs[idx]

    k = pl.program_id(2)

    @pl.when(k == 0)
    def _():
        acc_ref[...] = jnp.zeros_like(acc_ref)

    x = x_ref[...].astype(jnp.float32)
    if has_ln:
        # LayerNorm prologue (requires the K axis to be un-tiled -> full row).
        mean = jnp.mean(x, axis=-1, keepdims=True)
        xc = x - mean
        var = jnp.mean(xc * xc, axis=-1, keepdims=True)  # biased, like torch
        x = xc * jax.lax.rsqrt(var + eps) * g_ref[...] + bb_ref[...]

    acc_ref[...] += jnp.dot(x.astype(WEIGHT_DTYPE), w_ref[...],
                            preferred_element_type=jnp.float32)

    # Bias / GELU / residual only once, in the epilogue on the last K step.
    @pl.when(k == n_k - 1)
    def _():
        y = acc_ref[...] + b_ref[...]
        if activation == "gelu":
            y = 0.5 * y * (1.0 + _erf(y * (1.0 / math.sqrt(2.0))))
        if has_res:
            y = y + r_ref[...].astype(jnp.float32)
        o_ref[...] = y.astype(o_ref.dtype)


def fused_linear(x, w, b, *, ln_g=None, ln_b=None, activation=None,
                 residual=None, eps=LN_EPS,
                 tile_m=TILE_M, tile_n=TILE_N, tile_k=TILE_K):
    """y = [LN(x)] @ W + b  [-> GELU] [+ residual].

    x: [M, K] f32, w: [K, N] bf16, b: [N] f32, residual: [M, N] f32.
    """
    M, K = x.shape
    Kw, N = w.shape
    assert Kw == K
    has_ln = ln_g is not None
    has_res = residual is not None

    # --- tile selection (MXU-sized, lane-dense; falls back to full dims) ---
    tm = min(tile_m, _round_up(M, 8))
    Mp = _round_up(M, tm)

    tn = N
    for cand in (tile_n, 512, 256, 128):
        if cand <= N and N % cand == 0:
            tn = cand
            break

    if has_ln:
        tk = K  # LN prologue needs the full feature row.
    else:
        tk = K
        for cand in (tile_k, 2048, 1024, 512):
            if cand <= K and K % cand == 0:
                tk = cand
                break
    n_k = K // tk

    if Mp != M:
        x = jnp.pad(x, ((0, Mp - M), (0, 0)))
        if has_res:
            residual = jnp.pad(residual, ((0, Mp - M), (0, 0)))

    in_specs = [
        pl.BlockSpec((tm, tk), lambda i, j, k: (i, k)),
        pl.BlockSpec((tk, tn), lambda i, j, k: (k, j)),
        pl.BlockSpec((1, tn), lambda i, j, k: (0, j)),
    ]
    inputs = [x, w, b.reshape(1, N)]
    if has_ln:
        in_specs += [pl.BlockSpec((1, K), lambda i, j, k: (0, 0)),
                     pl.BlockSpec((1, K), lambda i, j, k: (0, 0))]
        inputs += [ln_g.reshape(1, K), ln_b.reshape(1, K)]
    if has_res:
        in_specs.append(pl.BlockSpec((tm, tn), lambda i, j, k: (i, j)))
        inputs.append(residual)

    out = pl.pallas_call(
        functools.partial(_fused_linear_kernel, n_k=n_k, has_ln=has_ln,
                          has_res=has_res, activation=activation, eps=eps),
        out_shape=jax.ShapeDtypeStruct((Mp, N), jnp.float32),
        grid_spec=pltpu.PrefetchScalarGridSpec(
            num_scalar_prefetch=0,
            grid=(Mp // tm, N // tn, n_k),
            in_specs=in_specs,
            out_specs=pl.BlockSpec((tm, tn), lambda i, j, k: (i, j)),
            scratch_shapes=[pltpu.VMEM((tm, tn), jnp.float32)],
        ),
        compiler_params=pltpu.CompilerParams(
            dimension_semantics=("parallel", "parallel", "arbitrary"),
            vmem_limit_bytes=32 * 1024 * 1024,
        ),
        cost_estimate=pl.CostEstimate(
            flops=2 * Mp * N * K,
            transcendentals=Mp * N if activation == "gelu" else 0,
            bytes_accessed=Mp * K * 4 + K * N * 2 + Mp * N * 4,
        ),
    )(*inputs)
    return out[:M] if Mp != M else out


# ------------------------------ attention kernel -----------------------------
def _attention_kernel(qkv_ref, o_ref, *, num_heads, head_dim, inv_scale):
    # qkv_ref block: (1, S, 3E) for one batch element; column layout is
    # [q (H*Dh) | k (H*Dh) | v (H*Dh)] with head h at lanes h*Dh:(h+1)*Dh.
    qkv = qkv_ref[0]                           # [S, 3E] f32
    emb = num_heads * head_dim
    q = qkv[:, 0:emb] * inv_scale              # fold 1/sqrt(Dh) into q
    k = qkv[:, emb:2 * emb]
    v = qkv[:, 2 * emb:3 * emb]

    outs = []
    for h in range(num_heads):                 # static unroll; heads stay in VMEM
        sl = slice(h * head_dim, (h + 1) * head_dim)
        q_h = q[:, sl].astype(WEIGHT_DTYPE)
        k_h = k[:, sl].astype(WEIGHT_DTYPE)
        v_h = v[:, sl].astype(WEIGHT_DTYPE)
        # q @ k^T without materializing the transpose.
        s = jax.lax.dot_general(q_h, k_h, (((1,), (1,)), ((), ())),
                                preferred_element_type=jnp.float32)    # [S, S]
        # NOTE: no causal mask, matching the reference module (mask=None).
        s = s - jnp.max(s, axis=-1, keepdims=True)
        p = jnp.exp(s)
        p = p * pl.reciprocal(jnp.sum(p, axis=-1, keepdims=True), approx=True)
        outs.append(jnp.dot(p.astype(WEIGHT_DTYPE), v_h,
                            preferred_element_type=jnp.float32))        # [S, Dh]
    # Single lane-dense [S, E] store (heads packed on the lane axis).
    o_ref[0] = jnp.concatenate(outs, axis=-1).astype(o_ref.dtype)


def attention(qkv2d, batch, seq):
    """qkv2d: [B*S, 3E] -> attention output [B*S, E] (full, un-masked softmax)."""
    # TODO(synk): for long sequences switch to a flash-style online-softmax loop
    # with a KV grid axis instead of materializing the full SxS scores per head.
    emb = NUM_HEADS * HEAD_DIM
    qkv3 = qkv2d.reshape(batch, seq, 3 * emb)  # free reshape, no transpose
    out = pl.pallas_call(
        functools.partial(_attention_kernel, num_heads=NUM_HEADS,
                          head_dim=HEAD_DIM, inv_scale=1.0 / math.sqrt(HEAD_DIM)),
        out_shape=jax.ShapeDtypeStruct((batch, seq, emb), jnp.float32),
        grid_spec=pltpu.PrefetchScalarGridSpec(
            num_scalar_prefetch=0,
            grid=(batch,),
            in_specs=[pl.BlockSpec((1, seq, 3 * emb), lambda b: (b, 0, 0))],
            out_specs=pl.BlockSpec((1, seq, emb), lambda b: (b, 0, 0)),
        ),
        compiler_params=pltpu.CompilerParams(dimension_semantics=("parallel",)),
    )(qkv3)
    return out.reshape(batch * seq, emb)


# ------------------------------- model (glue) -------------------------------
def decoder_layer(x2d, p, batch, seq):
    # x = attention(norm1(x)) + x      (LN fused into qkv proj, residual fused
    #                                   into the output projection epilogue)
    qkv = fused_linear(x2d, p["qkv_w"], p["qkv_b"],
                       ln_g=p["ln1_g"], ln_b=p["ln1_b"])
    attn = attention(qkv, batch, seq)
    x2d = fused_linear(attn, p["out_w"], p["out_b"], residual=x2d)
    # x = mlp(norm2(x)) + x            (LN + GELU fused into fc1, residual into fc2)
    h = fused_linear(x2d, p["fc1_w"], p["fc1_b"],
                     ln_g=p["ln2_g"], ln_b=p["ln2_b"], activation="gelu")
    x2d = fused_linear(h, p["fc2_w"], p["fc2_b"], residual=x2d)
    return x2d


def rotary_positions(seq_len, dim):
    # PhiRotaryEmbedding: cat(sin, cos) of t x inv_freq -> [seq_len, dim],
    # added to the token embeddings exactly like the reference module does.
    # (reference code indexes x.size(1) on a 1-D arange; the intended seq_len
    #  is used here.)
    inv_freq = 1.0 / (10000.0 ** (jnp.arange(0, dim, 2, dtype=jnp.float32) / dim))
    t = jnp.arange(seq_len, dtype=jnp.float32)
    sinusoid = t[:, None] * inv_freq[None, :]
    return jnp.concatenate([jnp.sin(sinusoid), jnp.cos(sinusoid)], axis=-1)


def phi_forward(tokens, params, labels=None):
    B, S = tokens.shape
    pos = rotary_positions(S, EMBED)                     # [S, E]
    x = params["tok_emb"][tokens] + pos[None, :, :]      # [B, S, E]
    # TODO(synk): nn.Dropout(0.1) treated as eval-mode identity (training RNG not reproduced).
    x2d = x.reshape(B * S, EMBED)
    for lp in params["layers"]:
        x2d = decoder_layer(x2d, lp, B, S)
    # final LayerNorm fused into the lm_head projection.
    logits = fused_linear(x2d, params["lm_w"], params["lm_b"],
                          ln_g=params["ln_f_g"], ln_b=params["ln_f_b"])
    logits = logits.reshape(B, S, VOCAB)
    loss = None
    if labels is not None:  # plain-JAX glue; demo calls with labels=None
        logp = jax.nn.log_softmax(logits.reshape(-1, VOCAB), axis=-1)
        loss = -jnp.mean(jnp.take_along_axis(logp, labels.reshape(-1, 1), axis=-1))
    return logits, loss


# ----------------------------- deterministic init ----------------------------
def init_params(key):
    n_dense = 1 + 4 * NUM_LAYERS + 1
    keys = iter(jax.random.split(key, 1 + n_dense))

    def dense(k, din, dout, scale=0.02):
        # torch nn.Linear stores [out, in]; we store the bf16 transpose [in, out].
        w = scale * jax.random.normal(k, (dout, din), jnp.float32)
        return w.T.astype(WEIGHT_DTYPE), jnp.zeros((dout,), jnp.float32)

    params = {"tok_emb": 0.02 * jax.random.normal(next(keys), (VOCAB, EMBED), jnp.float32)}
    layers = []
    for _ in range(NUM_LAYERS):
        lp = {
            "ln1_g": jnp.ones((EMBED,), jnp.float32),
            "ln1_b": jnp.zeros((EMBED,), jnp.float32),
            "ln2_g": jnp.ones((EMBED,), jnp.float32),
            "ln2_b": jnp.zeros((EMBED,), jnp.float32),
        }
        lp["qkv_w"], lp["qkv_b"] = dense(next(keys), EMBED, 3 * EMBED)
        lp["out_w"], lp["out_b"] = dense(next(keys), EMBED, EMBED)
        lp["fc1_w"], lp["fc1_b"] = dense(next(keys), EMBED, FFN_HIDDEN)
        lp["fc2_w"], lp["fc2_b"] = dense(next(keys), FFN_HIDDEN, EMBED)
        layers.append(lp)
    params["layers"] = layers
    params["ln_f_g"] = jnp.ones((EMBED,), jnp.float32)
    params["ln_f_b"] = jnp.zeros((EMBED,), jnp.float32)
    params["lm_w"], params["lm_b"] = dense(next(keys), EMBED, VOCAB)
    return params


if __name__ == "__main__":
    key = jax.random.PRNGKey(0)
    pkey, tkey = jax.random.split(key)
    params = init_params(pkey)
    tokens = jax.random.randint(tkey, (2, 8), 0, VOCAB, dtype=jnp.int32)

    logits, loss = phi_forward(tokens, params, labels=None)
    logits = jax.block_until_ready(logits)

    assert logits.shape == (2, 8, VOCAB), logits.shape
    assert bool(jnp.all(jnp.isfinite(logits)))
    print("KERNEL_OK")
</pallas_src>

<mosaic_0001>
module attributes {stable_mosaic.version = 11 : i64} {
  func.func @_fused_linear_kernel(%arg0: i32, %arg1: i32, %arg2: i32, %arg3: memref<16x64xf32, #tpu.memory_space<vmem>>, %arg4: memref<64x192xbf16, #tpu.memory_space<vmem>>, %arg5: memref<1x192xf32, #tpu.memory_space<vmem>>, %arg6: memref<1x64xf32, #tpu.memory_space<vmem>>, %arg7: memref<1x64xf32, #tpu.memory_space<vmem>>, %arg8: memref<16x192xf32, #tpu.memory_space<vmem>>, %arg9: memref<16x192xf32, #tpu.memory_space<vmem>>) attributes {dimension_semantics = [#tpu.dimension_semantics<parallel>, #tpu.dimension_semantics<parallel>, #tpu.dimension_semantics<arbitrary>], iteration_bounds = array<i64: 1, 1, 1>, scalar_prefetch = 0 : i64, scratch_operands = 1 : i64, tpu.core_type = #tpu.core_type<tc>, window_params = [{transform_indices = @transform_0, window_bounds = array<i64: 16, 64>}, {transform_indices = @transform_1, window_bounds = array<i64: 64, 192>}, {transform_indices = @transform_2, window_bounds = array<i64: 1, 192>}, {pipeline_mode = #tpu.pipeline_mode<synchronous>, transform_indices = @transform_3, window_bounds = array<i64: 1, 64>}, {pipeline_mode = #tpu.pipeline_mode<synchronous>, transform_indices = @transform_4, window_bounds = array<i64: 1, 64>}, {transform_indices = @transform_5, window_bounds = array<i64: 16, 192>}]} {
    %c0_i32 = arith.constant 0 : i32
    %0 = arith.cmpi eq, %arg2, %c0_i32 : i32
    %1 = arith.extui %0 : i1 to i32
    %c0_i32_0 = arith.constant 0 : i32
    %2 = arith.cmpi ne, %1, %c0_i32_0 : i32
    scf.if %2 {
      %cst_19 = arith.constant 0.000000e+00 : f32
      %35 = vector.broadcast %cst_19 : f32 to vector<16x192xf32>
      %c0_20 = arith.constant 0 : index
      %c0_21 = arith.constant 0 : index
      %36 = vector.load %arg9[%c0_20, %c0_21] : memref<16x192xf32, #tpu.memory_space<vmem>>, vector<16x192xf32>
      tpu.vector_store %arg9[%c0_20, %c0_21], %35 {strides = array<i32>} : memref<16x192xf32, #tpu.memory_space<vmem>>, vector<16x192xf32>,
    } else {
    }
    %c0 = arith.constant 0 : index
    %c0_1 = arith.constant 0 : index
    %3 = vector.load %arg3[%c0, %c0_1] : memref<16x64xf32, #tpu.memory_space<vmem>>, vector<16x64xf32>
    %cst = arith.constant dense<0.000000e+00> : vector<16xf32>
    %4 = vector.multi_reduction <add>, %3, %cst [1] : vector<16x64xf32> to vector<16xf32>
    %5 = vector.shape_cast %4 : vector<16xf32> to vector<16x1xf32>
    %cst_2 = arith.constant 6.400000e+01 : f32
    %6 = vector.broadcast %cst_2 : f32 to vector<16x1xf32>
    %7 = arith.divf %5, %6 : vector<16x1xf32>
    %8 = vector.broadcast %7 : vector<16x1xf32> to vector<16x64xf32>
    %9 = arith.subf %3, %8 : vector<16x64xf32>
    %10 = arith.mulf %9, %9 : vector<16x64xf32>
    %cst_3 = arith.constant dense<0.000000e+00> : vector<16xf32>
    %11 = vector.multi_reduction <add>, %10, %cst_3 [1] : vector<16x64xf32> to vector<16xf32>
    %12 = vector.shape_cast %11 : vector<16xf32> to vector<16x1xf32>
    %cst_4 = arith.constant 6.400000e+01 : f32
    %13 = vector.broadcast %cst_4 : f32 to vector<16x1xf32>
    %14 = arith.divf %12, %13 : vector<16x1xf32>
    %cst_5 = arith.constant 9.99999974E-6 : f32
    %15 = vector.broadcast %cst_5 : f32 to vector<16x1xf32>
    %16 = arith.addf %14, %15 : vector<16x1xf32>
    %17 = math.rsqrt %16 : vector<16x1xf32>
    %18 = vector.broadcast %17 : vector<16x1xf32> to vector<16x64xf32>
    %19 = arith.mulf %9, %18 : vector<16x64xf32>
    %c0_6 = arith.constant 0 : index
    %c0_7 = arith.constant 0 : index
    %20 = vector.load %arg6[%c0_6, %c0_7] : memref<1x64xf32, #tpu.memory_space<vmem>>, vector<1x64xf32>
    %21 = vector.broadcast %20 : vector<1x64xf32> to vector<16x64xf32>
    %22 = arith.mulf %19, %21 : vector<16x64xf32>
    %c0_8 = arith.constant 0 : index
    %c0_9 = arith.constant 0 : index
    %23 = vector.load %arg7[%c0_8, %c0_9] : memref<1x64xf32, #tpu.memory_space<vmem>>, vector<1x64xf32>
    %24 = vector.broadcast %23 : vector<1x64xf32> to vector<16x64xf32>
    %25 = arith.addf %22, %24 : vector<16x64xf32>
    %c0_10 = arith.constant 0 : index
    %c0_11 = arith.constant 0 : index
    %26 = vector.load %arg9[%c0_10, %c0_11] : memref<16x192xf32, #tpu.memory_space<vmem>>, vector<16x192xf32>
    %27 = arith.truncf %25 : vector<16x64xf32> to vector<16x64xbf16>
    %c0_12 = arith.constant 0 : index
    %c0_13 = arith.constant 0 : index
    %28 = vector.load %arg4[%c0_12, %c0_13] : memref<64x192xbf16, #tpu.memory_space<vmem>>, vector<64x192xbf16>
    %cst_14 = arith.constant dense<0.000000e+00> : vector<16x192xf32>
    %29 = tpu.matmul %27, %28, %cst_14 {dimension_numbers = #tpu.dot_dimension_numbers<[1], [0], [0], [1], [0, 0, 1, 1], [], []>} : vector<16x64xbf16>, vector<64x192xbf16>, vector<16x192xf32> -> vector<16x192xf32>
    %30 = arith.addf %26, %29 : vector<16x192xf32>
    %c0_15 = arith.constant 0 : index
    %c0_16 = arith.constant 0 : index
    %31 = vector.load %arg9[%c0_15, %c0_16] : memref<16x192xf32, #tpu.memory_space<vmem>>, vector<16x192xf32>
    tpu.vector_store %arg9[%c0_15, %c0_16], %30 {strides = array<i32>} : memref<16x192xf32, #tpu.memory_space<vmem>>, vector<16x192xf32>,
    %c0_i32_17 = arith.constant 0 : i32
    %32 = arith.cmpi eq, %arg2, %c0_i32_17 : i32
    %33 = arith.extui %32 : i1 to i32
    %c0_i32_18 = arith.constant 0 : i32
    %34 = arith.cmpi ne, %33, %c0_i32_18 : i32
    scf.if %34 {
      %c0_19 = arith.constant 0 : index
      %c0_20 = arith.constant 0 : index
      %35 = vector.load %arg9[%c0_19, %c0_20] : memref<16x192xf32, #tpu.memory_space<vmem>>, vector<16x192xf32>
      %c0_21 = arith.constant 0 : index
      %c0_22 = arith.constant 0 : index
      %36 = vector.load %arg5[%c0_21, %c0_22] : memref<1x192xf32, #tpu.memory_space<vmem>>, vector<1x192xf32>
      %37 = vector.broadcast %36 : vector<1x192xf32> to vector<16x192xf32>
      %38 = arith.addf %35, %37 : vector<16x192xf32>
      %c0_23 = arith.constant 0 : index
      %c0_24 = arith.constant 0 : index
      %39 = vector.load %arg8[%c0_23, %c0_24] : memref<16x192xf32, #tpu.memory_space<vmem>>, vector<16x192xf32>
      tpu.vector_store %arg8[%c0_23, %c0_24], %38 {strides = array<i32>} : memref<16x192xf32, #tpu.memory_space<vmem>>, vector<16x192xf32>,
    } else {
    }
    return
  }
  func.func @transform_0(%arg0: i32, %arg1: i32, %arg2: i32) -> (i32, i32) {
    %c0_i32 = arith.constant 0 : i32
    return %arg0, %arg2 : i32, i32
  }
  func.func @transform_1(%arg0: i32, %arg1: i32, %arg2: i32) -> (i32, i32) {
    %c0_i32 = arith.constant 0 : i32
    return %arg2, %arg1 : i32, i32
  }
  func.func @transform_2(%arg0: i32, %arg1: i32, %arg2: i32) -> (i32, i32) {
    %c0_i32 = arith.constant 0 : i32
    %c0_i32_0 = arith.constant 0 : i32
    return %c0_i32, %arg1 : i32, i32
  }
  func.func @transform_3(%arg0: i32, %arg1: i32, %arg2: i32) -> (i32, i32) {
    %c0_i32 = arith.constant 0 : i32
    %c0_i32_0 = arith.constant 0 : i32
    %c0_i32_1 = arith.constant 0 : i32
    return %c0_i32, %c0_i32_0 : i32, i32
  }
  func.func @transform_4(%arg0: i32, %arg1: i32, %arg2: i32) -> (i32, i32) {
    %c0_i32 = arith.constant 0 : i32
    %c0_i32_0 = arith.constant 0 : i32
    %c0_i32_1 = arith.constant 0 : i32
    return %c0_i32, %c0_i32_0 : i32, i32
  }
  func.func @transform_5(%arg0: i32, %arg1: i32, %arg2: i32) -> (i32, i32) {
    %c0_i32 = arith.constant 0 : i32
    return %arg0, %arg1 : i32, i32
  }
}

</mosaic_0001>

<bundles_post_ra>
// kernel: tpu_custom_call.1
= control target key start
LH: loop header
LB: loop body
LE: loop exit
PB: predicated region body
PF: predicated region fallthrough
CT: control target
= control target key end

     0   :  { %10 = vsyncpa [#allocation4], 0  ;;  %s462_s0 = inlined_call_operand.hbm [shape: f32[16,64], index: 0, kind: input, shape index: {}]   ;;  %s463_s1 = inlined_call_operand.hbm [shape: bf16[64,192], index: 1, kind: input, shape index: {}]   ;;  %s464_s2 = inlined_call_operand.vmem [shape: f32[1,192], index: 2, kind: input, shape index: {}]   ;;  %s465_s3 = inlined_call_operand.vmem [shape: f32[1,64], index: 3, kind: input, shape index: {}]   ;;  %s466_s4 = inlined_call_operand.vmem [shape: f32[1,64], index: 4, kind: input, shape index: {}]   ;;  %s467_s5 = inlined_call_operand.hbm [shape: f32[16,192], index: 5, kind: output, shape index: {}]  }
   0x1   :  { %11 = vsyncpa [#allocation7], 0 }
   0x2   :  { %12 = vsyncpa [#allocation5], 0  ;;  %s367_s18 = smov [#allocation3]   ;;  %s295_s22 = scalar_lea.hbm %s462_s0, 256 }
   0x3   :  { %s18_s19 = sshll.u32 %s367_s18, 4  ;;  %p296_p0 = scmp.ne.s32.totalorder %s462_s0, %s295_s22  ;;  %s19_s19 = int_to_ptr.vmem [resolvable:$true] %s18_s19 }
   0x4   :  { %p299_p1 = scmp.lt.u32.totalorder %s295_s22, %s462_s0 }
   0x6   :  { %p301_p2 = pnand %p299_p1, %p296_p0 }
   0x8   :  { %304 = shalt.err (!%p301_p2)
}
   0x9   :  { %s305_s27 = scalar_lea.vmem %s19_s19, 256  ;;  %p310_p4 = scmp.lt.s32.totalorder %s19_s19, %s19_s19 }
   0xa   :  { %p306_p3 = scmp.ne.s32.totalorder %s19_s19, %s305_s27  ;;  %p311_p5 = scmp.lt.s32.totalorder %s305_s27, %s305_s27 }
   0xc   :  { %p312_p6 = por %p311_p5, %p310_p4 }
   0xe   :  { %p313_p7 = pnand %p312_p6, %p306_p3 }
  0x10   :  { %316 = shalt.err (!%p313_p7)
}
  0x11   :  { %s368_s28 = smov 128   ;;  %s369_s29 = smov 8  }
  0x12   :  { %24 = dma.hbm_to_vmem [thread:$0]  %s462_s0, 256, %s19_s19, [#allocation4], %s368_s28, %s368_s28, %s369_s29  }
  0x13   :  { %s370_s7 = smov [#allocation6]   ;;  %s317_s11 = scalar_lea.hbm %s463_s1, 1024 }
  0x14   :  { %s30_s8 = sshll.u32 %s370_s7, 4  ;;  %p318_p8 = scmp.ne.s32.totalorder %s463_s1, %s317_s11  ;;  %s31_s8 = int_to_ptr.vmem [resolvable:$true] %s30_s8 }
  0x15   :  { %p321_p9 = scmp.lt.u32.totalorder %s317_s11, %s463_s1 }
  0x17   :  { %p323_p10 = pnand %p321_p9, %p318_p8 }
  0x19   :  { %326 = shalt.err (!%p323_p10)
}
  0x1a   :  { %s327_s16 = scalar_lea.vmem %s31_s8, 1024  ;;  %p332_p12 = scmp.lt.s32.totalorder %s31_s8, %s31_s8 }
  0x1b   :  { %p328_p11 = scmp.ne.s32.totalorder %s31_s8, %s327_s16  ;;  %p333_p13 = scmp.lt.s32.totalorder %s327_s16, %s327_s16 }
  0x1d   :  { %p334_p0 = por %p333_p13, %p332_p12 }
  0x1f   :  { %p335_p1 = pnand %p334_p0, %p328_p11 }
  0x21   :  { %338 = shalt.err (!%p335_p1)
}
  0x22   :  { %36 = dma.hbm_to_vmem [thread:$0]  %s463_s1, 1024, %s31_s8, [#allocation7], %s368_s28, %s368_s28, %s369_s29  }
  0x23   :  { %361 = dma.done.wait [#allocation4], 256  }
  0x24   :  { %362 = vsyncadd [#allocation4], 4294967040 }
  0x25   :  { %363 = dma.done.wait [#allocation7], 1024  }
  0x26   :  { %364 = vsyncadd [#allocation7], 4294966272  ;;  %vm55_vm0 = vcmask 523264   ;;  %v59_v0 = vld [vmem:[#allocation3] sm:$0xff]  ;;  %v60_v1 = vld [vmem:[#allocation3 + $0x8] sm:$0xff]  ;;  %v371_v22 = vmov 0   ;;  %v223_v41 = vlaneseq }
  0x27   :  { %v62_v2 = vsel %vm55_vm0, %v59_v0, 0.0  ;;  %v65_v3 = vsel %vm55_vm0, %v60_v1, 0.0  ;;  %v279_v14 = vld [vmem:[#allocation6 + $0x4] ss:$8 sps:$4 sm:$0xff]   ;;  %v281_v15 = vld [vmem:[#allocation6] ss:$8 sps:$4 sm:$0xff]   ;;  %195 = vmatprep.mubr.bf16.mxu0 %v371_v22 }
  0x28   :  { %63 = vadd.xlane.f32.xlu0 %v62_v2  ;;  %163 = vmatprep.subr.bf16.mxu0 %v279_v14  ;;  %v282_v16 = vld [vmem:[#allocation6 + $0x14] ss:$8 sps:$4 sm:$0xff]   ;;  %v284_v17 = vld [vmem:[#allocation6 + $0x10] ss:$8 sps:$4 sm:$0xff]   ;;  %v285_v18 = vld [vmem:[#allocation6 + $0x24] ss:$8 sps:$4 sm:$0xff]  }
  0x29   :  { %164 = vmatpush1.bf16.msra.mxu0 %v281_v15  ;;  %v287_v19 = vld [vmem:[#allocation6 + $0x20] ss:$8 sps:$4 sm:$0xff]   ;;  %v288_v20 = vld [vmem:[#allocation6 + $0x34] ss:$8 sps:$4 sm:$0xff]   ;;  %v290_v21 = vld [vmem:[#allocation6 + $0x30] ss:$8 sps:$4 sm:$0xff]  }
  0x2a   :  { %165 = vmatprep.subr.bf16.mxu0 %v282_v16  ;;  %v372_v23 = vmov 0.0   ;;  %v259_v32 = vld [vmem:[%s465_s3] ss:$0 sm:$0xff]  ;;  %v224_v42 = vshrl.u32 %v223_v41, 7 }
  0x2b   :  { %56 = vst.msk [vmem:[#allocation2 + $0x8] sm:$0xff] %vm55_vm0, %v372_v23  ;;  %58 = vst.msk [vmem:[#allocation2 + $0x18] sm:$0xff] %vm55_vm0, %v372_v23  ;;  %v260_v36 = vld [vmem:[%s466_s4] ss:$0 sm:$0xff] }
  0x2c   :  { %66 = vadd.xlane.f32.xlu0 %v65_v3  ;;  %v225_v43 = vsub.s32 0, %v224_v42  ;;  %v221_v44 = vld [vmem:[%s464_s2] sm:$0x3]  ;;  %v229_v55 = vsub.s32 1, %v224_v42  ;;  %s373_s2 = smov [#allocation8]  }
  0x2d   :  { %166 = vmatpush1.bf16.msra.mxu0 %v284_v17  ;;  %s246_s3 = sshll.u32 %s373_s2, 4  ;;  %s247_s3 = int_to_ptr.vmem [resolvable:$true] %s246_s3 }
  0x2e   :  { %167 = vmatprep.subr.bf16.mxu0 %v285_v18  ;;  %v226_v46 = vrot.slane %v221_v44, %v225_v43  ;;  %v230_v57 = vrot.slane %v221_v44, %v229_v55  ;;  %s339_s4 = scalar_lea.vmem %s247_s3, 512  ;;  %p344_p3 = scmp.lt.s32.totalorder %s247_s3, %s247_s3 }
  0x2f   :  { %p340_p2 = scmp.ne.s32.totalorder %s247_s3, %s339_s4  ;;  %p345_p4 = scmp.lt.s32.totalorder %s339_s4, %s339_s4 }
  0x31   :  { %168 = vmatpush1.bf16.msra.mxu0 %v287_v19  ;;  %p346_p5 = por %p345_p4, %p344_p3 }
  0x32   :  { %169 = vmatprep.subr.bf16.mxu0 %v288_v20  ;;  %v108_v45 = vld [vmem:[#allocation2 + $0x8] sm:$0xff]  ;;  %v110_v49 = vld [vmem:[#allocation2 + $0x18] sm:$0xff] }
  0x33   :  { %p347_p6 = pnand %p346_p5, %p340_p2 }
  0x35   :  { %170 = vmatpush1.bf16.msra.mxu0 %v290_v21 }
  0xb5   :  { %v64_v4 = vpop.xlane.xlu0 %63 }
  0xb6   :  { %v69_v5 = vmul.f32 0.015625, %v64_v4 }
  0xb8   :  { %v71_v6 = vsub.f32 %v59_v0, %v69_v5 }
  0xb9   :  { %v67_v7 = vpop.xlane.xlu0 %66 }
  0xba   :  { %v70_v8 = vmul.f32 0.015625, %v67_v7  ;;  %v73_v9 = vmul.f32 %v71_v6, %v71_v6 }
  0xbc   :  { %v72_v10 = vsub.f32 %v60_v1, %v70_v8  ;;  %v75_v11 = vsel %vm55_vm0, %v73_v9, 0.0 }
  0xbd   :  { %76 = vadd.xlane.f32.xlu1 %v75_v11 }
  0xbe   :  { %v74_v12 = vmul.f32 %v72_v10, %v72_v10 }
  0xc0   :  { %v78_v13 = vsel %vm55_vm0, %v74_v12, 0.0 }
  0xc1   :  { %79 = vadd.xlane.f32.xlu1 %v78_v13 }
 0x14a   :  { %v77_v24 = vpop.xlane.xlu1 %76 }
 0x14b   :  { %v81_v25 = vmul.f32 0.015625, %v77_v24 }
 0x14d   :  { %v83_v26 = vadd.f32 1e-05, %v81_v25 }
 0x14e   :  { %v80_v27 = vpop.xlane.xlu1 %79 }
 0x14f   :  { %291 = vrsqrt.f32 %v83_v26  ;;  %v82_v28 = vmul.f32 0.015625, %v80_v27 }
 0x151   :  { %v84_v29 = vadd.f32 1e-05, %v82_v28 }
 0x153   :  { %293 = vrsqrt.f32 %v84_v29 }
 0x159   :  { %v292_v30 = vpop.eup %291 }
 0x15a   :  { %v87_v31 = vmul.f32 %v292_v30, %v71_v6 }
 0x15c   :  { %v96_v35 = vmul.f32 %v259_v32, %v87_v31 }
 0x15d   :  { %v294_v33 = vpop.eup %293 }
 0x15e   :  { %v88_v34 = vmul.f32 %v294_v33, %v72_v10  ;;  %v105_v38 = vadd.f32 %v260_v36, %v96_v35 }
 0x160   :  { %v97_v37 = vmul.f32 %v259_v32, %v88_v34 }
 0x162   :  { %v106_v39 = vadd.f32 %v260_v36, %v97_v37 }
 0x164   :  { %v111_v40 = vpack.c.bf16 %v106_v39, %v105_v38 }
 0x166   :  { %269 = vmatmul.mubr.msk.bf16.vlgmr.msra.gmra.mrb[0].mxu0 %vm55_vm0, %v111_v40 }
 0x239   :  { %v197_v47 = vpop.f32.mrb[0].mxu0 }
 0x23a   :  { %v199_v48 = vpop.f32.mrb[1].mxu0  ;;  %v233_v53 = vadd.f32 %v226_v46, %v197_v47 }
 0x23b   :  { %v207_v50 = vadd.f32 %v199_v48, %v108_v45  ;;  %v201_v51 = vpop.f32.mrb[2].mxu0 }
 0x23c   :  { %v203_v52 = vpop.f32.mrb[3].mxu0  ;;  %v235_v56 = vadd.f32 %v226_v46, %v201_v51  ;;  %237 = vst [vmem:[#allocation8] sm:$0xff] %v233_v53 }
 0x23d   :  { %211 = vst.msk [vmem:[#allocation2 + $0x8] sm:$0xff] %vm55_vm0, %v207_v50  ;;  %v209_v54 = vadd.f32 %v203_v52, %v110_v49 }
 0x23e   :  { %239 = vst [vmem:[#allocation8 + $0x10] sm:$0xff] %v235_v56 }
 0x23f   :  { %213 = vst.msk [vmem:[#allocation2 + $0x18] sm:$0xff] %vm55_vm0, %v209_v54 }
 0x244   :  { %v218_v58 = vld [vmem:[#allocation2 + $0x8] sm:$0xff] }
 0x245   :  { %v234_v59 = vadd.f32 %v230_v57, %v218_v58 }
 0x246   :  { %v220_v60 = vld [vmem:[#allocation2 + $0x18] sm:$0xff] }
 0x247   :  { %v236_v61 = vadd.f32 %v230_v57, %v220_v60  ;;  %238 = vst.msk [vmem:[#allocation8 + $0x8] sm:$0xff] %vm55_vm0, %v234_v59 }
 0x249   :  { %240 = vst.msk [vmem:[#allocation8 + $0x18] sm:$0xff] %vm55_vm0, %v236_v61 }
 0x24a   :  { %350 = shalt.err (!%p347_p6)
}
 0x24b   :  { %s351_s25 = scalar_lea.hbm %s467_s5, 512 }
 0x24c   :  { %p352_p7 = scmp.ne.s32.totalorder %s467_s5, %s351_s25  ;;  %p355_p8 = scmp.lt.u32.totalorder %s351_s25, %s467_s5 }
 0x24e   :  { %p357_p9 = pnand %p355_p8, %p352_p7 }
 0x250   :  { %360 = shalt.err (!%p357_p9)
}
 0x251   :  { %s374_s30 = smov 256   ;;  %s375_s6 = smov 16  }
 0x252   :  { %252 = dma.vmem_to_hbm [thread:$0]  %s247_s3, 512, %s467_s5, [#allocation5], %s374_s30, %s374_s30, %s375_s6  }
 0x253   :  { %365 = dma.done.wait [#allocation5], 512  }
 0x254   :  { %366 = vsyncadd [#allocation5], 4294966784 }
 0x255   :  { %256 = vsyncpa [#allocation4], 1 }
 0x256   :  { %257 = vsyncpa [#allocation7], 1 }
 0x257   :  { %258 = vsyncpa [#allocation5], 1 }

</bundles_post_ra>
